<compile_context>
chip_gen: v5e
topology: v5e:2x2
jax: 0.10.0
libtpu: 0.0.40
codegen_flags: <defaults>
</compile_context>

<pallas_src>
import math
import functools

import numpy as np
import jax
import jax.numpy as jnp
from jax.experimental import pallas as pl
from jax.experimental.pallas import tpu as pltpu


def bert_attention_kernel(
    x_ref,        # (N, H)   f32   flattened hidden states (N = B*S)
    wqkv_ref,     # (H, 3H)  bf16  fused Q|K|V weight, (in, out)
    bqkv_ref,     # (1, 3H)  f32   fused Q|K|V bias
    wo_ref,       # (H, H)   bf16  output dense weight, (in, out)
    bo_ref,       # (1, H)   f32
    gamma_ref,    # (1, H)   f32   LayerNorm weight
    beta_ref,     # (1, H)   f32   LayerNorm bias
    hmask_ref,    # (L, H)   bf16  block-diagonal head mask (L = nh*N)
    amask_ref,    # (N, L)   f32   additive cross-batch mask (0 / -1e9)
    seg_ref,      # (L, L)   f32   0/1 block-diag segment-sum matrix (per head block)
    out_ref,      # (N, H)
    *,
    num_heads: int,
    head_size: int,
    hidden: int,
    eps: float,
):
    x_f32 = x_ref[...]                          # keep f32 for residual / LayerNorm
    x_bf = x_f32.astype(jnp.bfloat16)

    # ---- fused Q/K/V projection: ONE bf16 MXU matmul, f32 accumulation ----
    qkv = jnp.dot(x_bf, wqkv_ref[...], preferred_element_type=jnp.float32)
    qkv = qkv + bqkv_ref[...]                   # (N, 3H) f32

    H = hidden
    q = qkv[:, :H].astype(jnp.bfloat16)         # (N, H), heads stay in lanes
    k = qkv[:, H:2 * H].astype(jnp.bfloat16)
    v = qkv[:, 2 * H:].astype(jnp.bfloat16)

    # ---- packed-head K/V: replicate along sublanes, zero other heads' lanes ----
    hmask = hmask_ref[...]                      # (L, H) bf16
    kexp = jnp.concatenate([k] * num_heads, axis=0) * hmask   # (L, H)
    vexp = jnp.concatenate([v] * num_heads, axis=0) * hmask   # (L, H)

    # ---- all heads' scores in ONE matmul: (N,H) x (L,H)^T -> (N, L) ----
    scale = 1.0 / math.sqrt(head_size)
    scores = jax.lax.dot_general(
        q, kexp, (((1,), (1,)), ((), ())),
        preferred_element_type=jnp.float32)
    scores = scores * scale + amask_ref[...]    # cross-batch keys -> -1e9 (finite)

    # ---- softmax, normalized per 16-lane head block ----
    # Row max over all heads is a valid (conservative) stabilizer; exp(-1e9 - m)
    # underflows to exactly 0, so masked keys contribute nothing to the sums.
    m = jnp.max(scores, axis=-1, keepdims=True)
    e = jnp.exp(scores - m)                     # (N, L) f32
    # per-head-block denominators via an exact 0/1 block-diagonal matmul (MXU slot)
    denom = jnp.dot(e, seg_ref[...], preferred_element_type=jnp.float32)
    probs = e * pl.reciprocal(denom, approx=True)   # EUP reciprocal; VALU stays free
    # TODO(synk): attention_probs dropout / head_mask are eval-mode identity / None.

    # ---- context for all heads in ONE matmul; columns already (head, dim) merged ----
    ctx = jnp.dot(probs.astype(jnp.bfloat16), vexp,
                  preferred_element_type=jnp.float32)           # (N, H) f32

    # ---- BertSelfOutput: dense + (dropout) + residual + LayerNorm ----
    proj = jnp.dot(ctx.astype(jnp.bfloat16), wo_ref[...],
                   preferred_element_type=jnp.float32) + bo_ref[...]
    # TODO(synk): hidden dropout (eval mode -> identity)
    resid = proj + x_f32

    mean = jnp.mean(resid, axis=-1, keepdims=True)
    centered = resid - mean
    var = jnp.mean(centered * centered, axis=-1, keepdims=True)
    y = centered * jax.lax.rsqrt(var + eps) * gamma_ref[...] + beta_ref[...]

    out_ref[...] = y.astype(out_ref.dtype)


def bert_attention(
    x,            # (B, S, H)
    wq, bq, wk, bk, wv, bv,   # torch-style Linear weights (out, in); biases (H,)
    wo, bo,
    gamma, beta,
    *,
    num_heads: int,
    eps: float = 1e-12,
):
    B, S, H = x.shape
    head_size = H // num_heads
    N = B * S                 # total tokens
    L = num_heads * N         # packed key/value rows (head-major)

    # ---- wrapper-side weight prep (cheap XLA ops, outside the kernel) ----
    wqkv = jnp.concatenate([wq.T, wk.T, wv.T], axis=1).astype(jnp.bfloat16)  # (H, 3H)
    bqkv = jnp.concatenate([bq, bk, bv]).reshape(1, 3 * H)                   # (1, 3H) f32
    wo_t = wo.T.astype(jnp.bfloat16)                                         # (H, H)
    bo2 = bo.reshape(1, H)
    gamma2, beta2 = gamma.reshape(1, H), beta.reshape(1, H)

    # ---- precomputed attention masks (constants) ----
    l_idx = np.arange(L)
    head_of_l = l_idx // N                 # packed row -> head index
    key_batch = (l_idx % N) // S           # packed row -> key's batch index
    j_head = np.arange(H) // head_size     # lane -> head index
    q_batch = np.arange(N) // S            # token row -> batch index

    headmask = (head_of_l[:, None] == j_head[None, :]).astype(np.float32)    # (L, H)
    amask = np.where(q_batch[:, None] == key_batch[None, :],
                     0.0, -1e9).astype(np.float32)                           # (N, L)
    seg = (head_of_l[:, None] == head_of_l[None, :]).astype(np.float32)      # (L, L)

    headmask = jnp.asarray(headmask, dtype=jnp.bfloat16)
    amask = jnp.asarray(amask)
    seg = jnp.asarray(seg)

    x_flat = x.reshape(N, H)

    kernel = functools.partial(
        bert_attention_kernel,
        num_heads=num_heads,
        head_size=head_size,
        hidden=H,
        eps=eps,
    )

    full = lambda shape: pl.BlockSpec(shape, lambda i: (0,) * len(shape))

    out = pl.pallas_call(
        kernel,
        out_shape=jax.ShapeDtypeStruct((N, H), x.dtype),
        grid_spec=pltpu.PrefetchScalarGridSpec(
            num_scalar_prefetch=0,
            grid=(1,),                         # single step: no per-batch grid overhead
            in_specs=[
                full((N, H)),                  # x_flat
                full((H, 3 * H)),              # wqkv (bf16)
                full((1, 3 * H)),              # bqkv
                full((H, H)),                  # wo (bf16)
                full((1, H)),                  # bo
                full((1, H)),                  # gamma
                full((1, H)),                  # beta
                full((L, H)),                  # head mask (bf16)
                full((N, L)),                  # additive cross-batch mask
                full((L, L)),                  # segment-sum matrix
            ],
            out_specs=full((N, H)),
        ),
        compiler_params=pltpu.CompilerParams(
            dimension_semantics=("arbitrary",),
        ),
    )(x_flat, wqkv, bqkv, wo_t, bo2, gamma2, beta2, headmask, amask, seg)

    return out.reshape(B, S, H)


if __name__ == "__main__":
    # Small config consistent with the module: hidden=32, heads=4, seq=8, batch=2
    B, S, H = 2, 8, 32
    NUM_HEADS = 4

    key = jax.random.PRNGKey(0)
    keys = jax.random.split(key, 10)

    x = jax.random.normal(keys[0], (B, S, H), dtype=jnp.float32)

    std = 0.02
    wq = std * jax.random.normal(keys[1], (H, H), dtype=jnp.float32)
    wk = std * jax.random.normal(keys[2], (H, H), dtype=jnp.float32)
    wv = std * jax.random.normal(keys[3], (H, H), dtype=jnp.float32)
    wo = std * jax.random.normal(keys[4], (H, H), dtype=jnp.float32)
    bq = std * jax.random.normal(keys[5], (H,), dtype=jnp.float32)
    bk = std * jax.random.normal(keys[6], (H,), dtype=jnp.float32)
    bv = std * jax.random.normal(keys[7], (H,), dtype=jnp.float32)
    bo = std * jax.random.normal(keys[8], (H,), dtype=jnp.float32)
    gamma = jnp.ones((H,), dtype=jnp.float32)
    beta = jnp.zeros((H,), dtype=jnp.float32)

    out = bert_attention(
        x, wq, bq, wk, bk, wv, bv, wo, bo, gamma, beta, num_heads=NUM_HEADS
    )
    out = jax.block_until_ready(out)

    # Pure-JAX f32 reference for a sanity check
    def ref(x):
        def lin(h, w, b):
            return h @ w.T + b
        hd = H // NUM_HEADS
        q = lin(x, wq, bq).reshape(B, S, NUM_HEADS, hd).transpose(0, 2, 1, 3)
        k = lin(x, wk, bk).reshape(B, S, NUM_HEADS, hd).transpose(0, 2, 1, 3)
        v = lin(x, wv, bv).reshape(B, S, NUM_HEADS, hd).transpose(0, 2, 1, 3)
        s = jnp.einsum("bhqd,bhkd->bhqk", q, k) / math.sqrt(hd)
        p = jax.nn.softmax(s, axis=-1)
        ctx = jnp.einsum("bhqk,bhkd->bhqd", p, v).transpose(0, 2, 1, 3).reshape(B, S, H)
        proj = lin(ctx, wo, bo) + x
        mu = proj.mean(-1, keepdims=True)
        var = ((proj - mu) ** 2).mean(-1, keepdims=True)
        return (proj - mu) / jnp.sqrt(var + 1e-12) * gamma + beta

    expected = ref(x)
    # tolerance accounts for bf16 MXU operands + EUP approx reciprocal in softmax
    err = float(jnp.max(jnp.abs(out - expected)))
    assert jnp.allclose(out, expected, atol=1e-2, rtol=1e-2), err
    print("KERNEL_OK")
</pallas_src>

<mosaic_0001>
module attributes {stable_mosaic.version = 11 : i64} {
  func.func @bert_attention_kernel(%arg0: i32, %arg1: memref<16x32xf32, #tpu.memory_space<vmem>>, %arg2: memref<32x96xbf16, #tpu.memory_space<vmem>>, %arg3: memref<1x96xf32, #tpu.memory_space<vmem>>, %arg4: memref<32x32xbf16, #tpu.memory_space<vmem>>, %arg5: memref<1x32xf32, #tpu.memory_space<vmem>>, %arg6: memref<1x32xf32, #tpu.memory_space<vmem>>, %arg7: memref<1x32xf32, #tpu.memory_space<vmem>>, %arg8: memref<64x32xbf16, #tpu.memory_space<vmem>>, %arg9: memref<16x64xf32, #tpu.memory_space<vmem>>, %arg10: memref<64x64xf32, #tpu.memory_space<vmem>>, %arg11: memref<16x32xf32, #tpu.memory_space<vmem>>) attributes {dimension_semantics = [#tpu.dimension_semantics<arbitrary>], iteration_bounds = array<i64: 1>, scalar_prefetch = 0 : i64, scratch_operands = 0 : i64, tpu.core_type = #tpu.core_type<tc>, window_params = [{pipeline_mode = #tpu.pipeline_mode<synchronous>, transform_indices = @transform_0, window_bounds = array<i64: 16, 32>}, {pipeline_mode = #tpu.pipeline_mode<synchronous>, transform_indices = @transform_1, window_bounds = array<i64: 32, 96>}, {pipeline_mode = #tpu.pipeline_mode<synchronous>, transform_indices = @transform_2, window_bounds = array<i64: 1, 96>}, {pipeline_mode = #tpu.pipeline_mode<synchronous>, transform_indices = @transform_3, window_bounds = array<i64: 32, 32>}, {pipeline_mode = #tpu.pipeline_mode<synchronous>, transform_indices = @transform_4, window_bounds = array<i64: 1, 32>}, {pipeline_mode = #tpu.pipeline_mode<synchronous>, transform_indices = @transform_5, window_bounds = array<i64: 1, 32>}, {pipeline_mode = #tpu.pipeline_mode<synchronous>, transform_indices = @transform_6, window_bounds = array<i64: 1, 32>}, {pipeline_mode = #tpu.pipeline_mode<synchronous>, transform_indices = @transform_7, window_bounds = array<i64: 64, 32>}, {pipeline_mode = #tpu.pipeline_mode<synchronous>, transform_indices = @transform_8, window_bounds = array<i64: 16, 64>}, {pipeline_mode = #tpu.pipeline_mode<synchronous>, transform_indices = @transform_9, window_bounds = array<i64: 64, 64>}, {pipeline_mode = #tpu.pipeline_mode<synchronous>, transform_indices = @transform_10, window_bounds = array<i64: 16, 32>}]} {
    %c0 = arith.constant 0 : index
    %c0_0 = arith.constant 0 : index
    %0 = vector.load %arg1[%c0, %c0_0] : memref<16x32xf32, #tpu.memory_space<vmem>>, vector<16x32xf32>
    %1 = arith.truncf %0 : vector<16x32xf32> to vector<16x32xbf16>
    %c0_1 = arith.constant 0 : index
    %c0_2 = arith.constant 0 : index
    %2 = vector.load %arg2[%c0_1, %c0_2] : memref<32x96xbf16, #tpu.memory_space<vmem>>, vector<32x96xbf16>
    %cst = arith.constant dense<0.000000e+00> : vector<16x96xf32>
    %3 = tpu.matmul %1, %2, %cst {dimension_numbers = #tpu.dot_dimension_numbers<[1], [0], [0], [1], [0, 0, 1, 1], [], []>} : vector<16x32xbf16>, vector<32x96xbf16>, vector<16x96xf32> -> vector<16x96xf32>
    %c0_3 = arith.constant 0 : index
    %c0_4 = arith.constant 0 : index
    %4 = vector.load %arg3[%c0_3, %c0_4] : memref<1x96xf32, #tpu.memory_space<vmem>>, vector<1x96xf32>
    %5 = vector.broadcast %4 : vector<1x96xf32> to vector<16x96xf32>
    %6 = arith.addf %3, %5 : vector<16x96xf32>
    %7 = vector.extract_strided_slice %6 {offsets = [0, 0], sizes = [16, 32], strides = [1, 1]} : vector<16x96xf32> to vector<16x32xf32>
    %8 = arith.truncf %7 : vector<16x32xf32> to vector<16x32xbf16>
    %9 = vector.extract_strided_slice %6 {offsets = [0, 32], sizes = [16, 32], strides = [1, 1]} : vector<16x96xf32> to vector<16x32xf32>
    %10 = arith.truncf %9 : vector<16x32xf32> to vector<16x32xbf16>
    %11 = vector.extract_strided_slice %6 {offsets = [0, 64], sizes = [16, 32], strides = [1, 1]} : vector<16x96xf32> to vector<16x32xf32>
    %12 = arith.truncf %11 : vector<16x32xf32> to vector<16x32xbf16>
    %c0_5 = arith.constant 0 : index
    %c0_6 = arith.constant 0 : index
    %13 = vector.load %arg8[%c0_5, %c0_6] : memref<64x32xbf16, #tpu.memory_space<vmem>>, vector<64x32xbf16>
    %14 = tpu.concatenate %10, %10, %10, %10 in 0 : vector<16x32xbf16>, vector<16x32xbf16>, vector<16x32xbf16>, vector<16x32xbf16> -> vector<64x32xbf16>
    %15 = arith.mulf %14, %13 : vector<64x32xbf16>
    %16 = tpu.concatenate %12, %12, %12, %12 in 0 : vector<16x32xbf16>, vector<16x32xbf16>, vector<16x32xbf16>, vector<16x32xbf16> -> vector<64x32xbf16>
    %17 = arith.mulf %16, %13 : vector<64x32xbf16>
    %cst_7 = arith.constant dense<0.000000e+00> : vector<16x64xf32>
    %18 = tpu.matmul %8, %15, %cst_7 {dimension_numbers = #tpu.dot_dimension_numbers<[1], [1], [0], [0], [0, 0, 1, 0], [], []>} : vector<16x32xbf16>, vector<64x32xbf16>, vector<16x64xf32> -> vector<16x64xf32>
    %cst_8 = arith.constant 0.353553385 : f32
    %19 = vector.broadcast %cst_8 : f32 to vector<16x64xf32>
    %20 = arith.mulf %18, %19 : vector<16x64xf32>
    %c0_9 = arith.constant 0 : index
    %c0_10 = arith.constant 0 : index
    %21 = vector.load %arg9[%c0_9, %c0_10] : memref<16x64xf32, #tpu.memory_space<vmem>>, vector<16x64xf32>
    %22 = arith.addf %20, %21 : vector<16x64xf32>
    %cst_11 = arith.constant dense<0xFF800000> : vector<16xf32>
    %23 = vector.multi_reduction <maximumf>, %22, %cst_11 [1] : vector<16x64xf32> to vector<16xf32>
    %24 = vector.shape_cast %23 : vector<16xf32> to vector<16x1xf32>
    %25 = vector.broadcast %24 : vector<16x1xf32> to vector<16x64xf32>
    %26 = arith.subf %22, %25 : vector<16x64xf32>
    %27 = math.exp %26 : vector<16x64xf32>
    %c0_12 = arith.constant 0 : index
    %c0_13 = arith.constant 0 : index
    %28 = vector.load %arg10[%c0_12, %c0_13] : memref<64x64xf32, #tpu.memory_space<vmem>>, vector<64x64xf32>
    %cst_14 = arith.constant dense<0.000000e+00> : vector<16x64xf32>
    %29 = tpu.matmul %27, %28, %cst_14 {dimension_numbers = #tpu.dot_dimension_numbers<[1], [0], [0], [1], [0, 0, 1, 1], [], []>} : vector<16x64xf32>, vector<64x64xf32>, vector<16x64xf32> -> vector<16x64xf32>
    %30 = tpu.reciprocal %29 {approx = true} : vector<16x64xf32> -> vector<16x64xf32>
    %31 = arith.mulf %27, %30 : vector<16x64xf32>
    %32 = arith.truncf %31 : vector<16x64xf32> to vector<16x64xbf16>
    %cst_15 = arith.constant dense<0.000000e+00> : vector<16x32xf32>
    %33 = tpu.matmul %32, %17, %cst_15 {dimension_numbers = #tpu.dot_dimension_numbers<[1], [0], [0], [1], [0, 0, 1, 1], [], []>} : vector<16x64xbf16>, vector<64x32xbf16>, vector<16x32xf32> -> vector<16x32xf32>
    %34 = arith.truncf %33 : vector<16x32xf32> to vector<16x32xbf16>
    %c0_16 = arith.constant 0 : index
    %c0_17 = arith.constant 0 : index
    %35 = vector.load %arg4[%c0_16, %c0_17] : memref<32x32xbf16, #tpu.memory_space<vmem>>, vector<32x32xbf16>
    %cst_18 = arith.constant dense<0.000000e+00> : vector<16x32xf32>
    %36 = tpu.matmul %34, %35, %cst_18 {dimension_numbers = #tpu.dot_dimension_numbers<[1], [0], [0], [1], [0, 0, 1, 1], [], []>} : vector<16x32xbf16>, vector<32x32xbf16>, vector<16x32xf32> -> vector<16x32xf32>
    %c0_19 = arith.constant 0 : index
    %c0_20 = arith.constant 0 : index
    %37 = vector.load %arg5[%c0_19, %c0_20] : memref<1x32xf32, #tpu.memory_space<vmem>>, vector<1x32xf32>
    %38 = vector.broadcast %37 : vector<1x32xf32> to vector<16x32xf32>
    %39 = arith.addf %36, %38 : vector<16x32xf32>
    %40 = arith.addf %39, %0 : vector<16x32xf32>
    %cst_21 = arith.constant dense<0.000000e+00> : vector<16xf32>
    %41 = vector.multi_reduction <add>, %40, %cst_21 [1] : vector<16x32xf32> to vector<16xf32>
    %42 = vector.shape_cast %41 : vector<16xf32> to vector<16x1xf32>
    %cst_22 = arith.constant 3.200000e+01 : f32
    %43 = vector.broadcast %cst_22 : f32 to vector<16x1xf32>
    %44 = arith.divf %42, %43 : vector<16x1xf32>
    %45 = vector.broadcast %44 : vector<16x1xf32> to vector<16x32xf32>
    %46 = arith.subf %40, %45 : vector<16x32xf32>
    %47 = arith.mulf %46, %46 : vector<16x32xf32>
    %cst_23 = arith.constant dense<0.000000e+00> : vector<16xf32>
    %48 = vector.multi_reduction <add>, %47, %cst_23 [1] : vector<16x32xf32> to vector<16xf32>
    %49 = vector.shape_cast %48 : vector<16xf32> to vector<16x1xf32>
    %cst_24 = arith.constant 3.200000e+01 : f32
    %50 = vector.broadcast %cst_24 : f32 to vector<16x1xf32>
    %51 = arith.divf %49, %50 : vector<16x1xf32>
    %cst_25 = arith.constant 9.99999996E-13 : f32
    %52 = vector.broadcast %cst_25 : f32 to vector<16x1xf32>
    %53 = arith.addf %51, %52 : vector<16x1xf32>
    %54 = math.rsqrt %53 : vector<16x1xf32>
    %55 = vector.broadcast %54 : vector<16x1xf32> to vector<16x32xf32>
    %56 = arith.mulf %46, %55 : vector<16x32xf32>
    %c0_26 = arith.constant 0 : index
    %c0_27 = arith.constant 0 : index
    %57 = vector.load %arg6[%c0_26, %c0_27] : memref<1x32xf32, #tpu.memory_space<vmem>>, vector<1x32xf32>
    %58 = vector.broadcast %57 : vector<1x32xf32> to vector<16x32xf32>
    %59 = arith.mulf %56, %58 : vector<16x32xf32>
    %c0_28 = arith.constant 0 : index
    %c0_29 = arith.constant 0 : index
    %60 = vector.load %arg7[%c0_28, %c0_29] : memref<1x32xf32, #tpu.memory_space<vmem>>, vector<1x32xf32>
    %61 = vector.broadcast %60 : vector<1x32xf32> to vector<16x32xf32>
    %62 = arith.addf %59, %61 : vector<16x32xf32>
    %c0_30 = arith.constant 0 : index
    %c0_31 = arith.constant 0 : index
    %63 = vector.load %arg11[%c0_30, %c0_31] : memref<16x32xf32, #tpu.memory_space<vmem>>, vector<16x32xf32>
    tpu.vector_store %arg11[%c0_30, %c0_31], %62 {strides = array<i32>} : memref<16x32xf32, #tpu.memory_space<vmem>>, vector<16x32xf32>,
    return
  }
  func.func @transform_0(%arg0: i32) -> (i32, i32) {
    %c0_i32 = arith.constant 0 : i32
    %c0_i32_0 = arith.constant 0 : i32
    %c0_i32_1 = arith.constant 0 : i32
    return %c0_i32, %c0_i32_0 : i32, i32
  }
  func.func @transform_1(%arg0: i32) -> (i32, i32) {
    %c0_i32 = arith.constant 0 : i32
    %c0_i32_0 = arith.constant 0 : i32
    %c0_i32_1 = arith.constant 0 : i32
    return %c0_i32, %c0_i32_0 : i32, i32
  }
  func.func @transform_2(%arg0: i32) -> (i32, i32) {
    %c0_i32 = arith.constant 0 : i32
    %c0_i32_0 = arith.constant 0 : i32
    %c0_i32_1 = arith.constant 0 : i32
    return %c0_i32, %c0_i32_0 : i32, i32
  }
  func.func @transform_3(%arg0: i32) -> (i32, i32) {
    %c0_i32 = arith.constant 0 : i32
    %c0_i32_0 = arith.constant 0 : i32
    %c0_i32_1 = arith.constant 0 : i32
    return %c0_i32, %c0_i32_0 : i32, i32
  }
  func.func @transform_4(%arg0: i32) -> (i32, i32) {
    %c0_i32 = arith.constant 0 : i32
    %c0_i32_0 = arith.constant 0 : i32
    %c0_i32_1 = arith.constant 0 : i32
    return %c0_i32, %c0_i32_0 : i32, i32
  }
  func.func @transform_5(%arg0: i32) -> (i32, i32) {
    %c0_i32 = arith.constant 0 : i32
    %c0_i32_0 = arith.constant 0 : i32
    %c0_i32_1 = arith.constant 0 : i32
    return %c0_i32, %c0_i32_0 : i32, i32
  }
  func.func @transform_6(%arg0: i32) -> (i32, i32) {
    %c0_i32 = arith.constant 0 : i32
    %c0_i32_0 = arith.constant 0 : i32
    %c0_i32_1 = arith.constant 0 : i32
    return %c0_i32, %c0_i32_0 : i32, i32
  }
  func.func @transform_7(%arg0: i32) -> (i32, i32) {
    %c0_i32 = arith.constant 0 : i32
    %c0_i32_0 = arith.constant 0 : i32
    %c0_i32_1 = arith.constant 0 : i32
    return %c0_i32, %c0_i32_0 : i32, i32
  }
  func.func @transform_8(%arg0: i32) -> (i32, i32) {
    %c0_i32 = arith.constant 0 : i32
    %c0_i32_0 = arith.constant 0 : i32
    %c0_i32_1 = arith.constant 0 : i32
    return %c0_i32, %c0_i32_0 : i32, i32
  }
  func.func @transform_9(%arg0: i32) -> (i32, i32) {
    %c0_i32 = arith.constant 0 : i32
    %c0_i32_0 = arith.constant 0 : i32
    %c0_i32_1 = arith.constant 0 : i32
    return %c0_i32, %c0_i32_0 : i32, i32
  }
  func.func @transform_10(%arg0: i32) -> (i32, i32) {
    %c0_i32 = arith.constant 0 : i32
    %c0_i32_0 = arith.constant 0 : i32
    %c0_i32_1 = arith.constant 0 : i32
    return %c0_i32, %c0_i32_0 : i32, i32
  }
}

</mosaic_0001>

<bundles_post_ra>
// kernel: tpu_custom_call.1
= control target key start
LH: loop header
LB: loop body
LE: loop exit
PB: predicated region body
PF: predicated region fallthrough
CT: control target
= control target key end

     0   :  { %15 = vsyncpa [#allocation3], 0  ;;  %s850_s0 = inlined_call_operand.vmem [shape: f32[16,32], index: 0, kind: input, shape index: {}]   ;;  %s851_s1 = inlined_call_operand.vmem [shape: bf16[32,96], index: 1, kind: input, shape index: {}]   ;;  %s852_s2 = inlined_call_operand.vmem [shape: f32[1,96], index: 2, kind: input, shape index: {}]   ;;  %s853_s3 = inlined_call_operand.vmem [shape: bf16[32,32], index: 3, kind: input, shape index: {}]   ;;  %s854_s4 = inlined_call_operand.vmem [shape: f32[1,32], index: 4, kind: input, shape index: {}]   ;;  %s855_s5 = inlined_call_operand.vmem [shape: f32[1,32], index: 5, kind: input, shape index: {}]   ;;  %s856_s6 = inlined_call_operand.vmem [shape: f32[1,32], index: 6, kind: input, shape index: {}]   ;;  %s857_s7 = inlined_call_operand.vmem [shape: bf16[64,32], index: 7, kind: input, shape index: {}]   ;;  %s858_s8 = inlined_call_operand.hbm [shape: f32[16,64], index: 8, kind: input, shape index: {}]   ;;  %s859_s9 = inlined_call_operand.hbm [shape: f32[64,64], index: 9, kind: input, shape index: {}]   ;;  %s860_s10 = inlined_call_operand.hbm [shape: f32[16,32], index: 10, kind: output, shape index: {}]  }
   0x1   :  { %16 = vsyncpa [#allocation6], 0 }
   0x2   :  { %17 = vsyncpa [#allocation4], 0  ;;  %s38_s15 = sshll.u32 %s858_s8, 4  ;;  %s667_s16 = smov [#allocation2]   ;;  %s39_s15 = int_to_ptr.hbm [resolvable:$true] %s38_s15 }
   0x3   :  { %s40_s17 = sshll.u32 %s667_s16, 4  ;;  %s51_s20 = sshll.u32 %s859_s9, 4  ;;  %s41_s17 = int_to_ptr.vmem [resolvable:$true] %s40_s17  ;;  %s52_s20 = int_to_ptr.hbm [resolvable:$true] %s51_s20 }
   0x4   :  { %s668_s21 = smov 128   ;;  %s669_s22 = smov 8  }
   0x5   :  { %46 = dma.hbm_to_vmem [thread:$0]  %s39_s15, 256, %s41_s17, [#allocation3], %s668_s21, %s668_s21, %s669_s22  }
   0x6   :  { %s670_s23 = smov [#allocation5]  }
   0x7   :  { %s53_s24 = sshll.u32 %s670_s23, 4  ;;  %s54_s24 = int_to_ptr.vmem [resolvable:$true] %s53_s24 }
   0x8   :  { %59 = dma.hbm_to_vmem [thread:$0]  %s52_s20, 1024, %s54_s24, [#allocation6], %s668_s21, %s668_s21, %s669_s22  }
   0x9   :  { %661 = dma.done.wait [#allocation3], 256  }
   0xa   :  { %662 = vsyncadd [#allocation3], 4294967040 }
   0xb   :  { %663 = dma.done.wait [#allocation6], 1024  }
   0xc   :  { %664 = vsyncadd [#allocation6], 4294966272  ;;  %v500_v0 = vld [vmem:[%s851_s1 + $0x8] sm:$0xff]  ;;  %v499_v1 = vld [vmem:[%s851_s1] sm:$0xff]  ;;  %vm92_vm0 = vcmask 261120   ;;  %s673_s19 = smov 64  }
   0xd   :  { %v521_v2 = vld [vmem:[%s857_s7 + $0x18] sm:$0xff]   ;;  %v519_v3 = vld [vmem:[%s857_s7 + $0x8] sm:$0xff]   ;;  %102 = vmatpush.bf16.msra.mxu0 %v500_v0  ;;  %v758_v4 = vld [vmem:[%s850_s0] sm:$0xff]  ;;  %vm264_vm1 = vcmask 523264   ;;  %s463_s11 = sshll.u32 %s860_s10, 4  ;;  %s464_s11 = int_to_ptr.hbm [resolvable:$true] %s463_s11 }
   0xe   :  { %v763_v5 = vld [vmem:[%s850_s0 + $0x8] sm:$0xff]  ;;  %v517_v6 = vunpack.c.l.bf16 %v521_v2  ;;  %v518_v7 = vunpack.c.h.bf16 %v521_v2  ;;  %v509_v8 = vunpack.c.l.bf16 %v519_v3  ;;  %v510_v9 = vunpack.c.h.bf16 %v519_v3  ;;  %v520_v10 = vld [vmem:[%s857_s7 + $0x10] sm:$0xff]   ;;  %v504_v12 = vld [vmem:[%s857_s7] sm:$0xff]   ;;  %s671_s0 = smov 32  }
   0xf   :  { %v71_v13 = vpack.c.bf16 %v763_v5, %v758_v4  ;;  %v513_v15 = vunpack.c.l.bf16 %v520_v10  ;;  %v514_v16 = vunpack.c.h.bf16 %v520_v10  ;;  %v505_v17 = vunpack.c.l.bf16 %v504_v12  ;;  %v571_v22 = vld [vmem:[%s852_s2] ss:$0 sm:$0xff]  ;;  %s672_s2 = smov 96  }
  0x10   :  { %v531_v11 = vpack.i.bf16 %v518_v7, %v517_v6  ;;  %v541_v14 = vpack.i.bf16 %v510_v9, %v509_v8  ;;  %v506_v18 = vunpack.c.h.bf16 %v504_v12 }
  0x11   :  { %103 = vmatpush.bf16.msra.mxu0 %v499_v1  ;;  %v536_v19 = vpack.i.bf16 %v514_v16, %v513_v15 }
  0x12   :  { %532 = vrot.lane.b32.xlu0 %v531_v11, %s671_s0  ;;  %542 = vrot.lane.b32.xlu1 %v541_v14, %s671_s0  ;;  %v546_v20 = vpack.i.bf16 %v506_v18, %v505_v17 }
  0x14   :  { %485 = vmatmul.msk.bf16.vlgmr.msra.gmra.mxu0 %vm92_vm0, %v71_v13 }
  0x1a   :  { %537 = vrot.lane.b32.xlu0 %v536_v19, %s671_s0  ;;  %547 = vrot.lane.b32.xlu1 %v546_v20, %s671_s0 }
  0x84   :  { %v543_v23 = vpop.permute.xlu1 %542  ;;  %v533_v27 = vpop.permute.xlu0 %532 }
  0x85   :  { %v535_v37 = vunpack.i.h.bf16 %v533_v27  ;;  %v534_v38 = vunpack.i.l.bf16 %v533_v27  ;;  %v545_v39 = vunpack.i.h.bf16 %v543_v23  ;;  %v544_v40 = vunpack.i.l.bf16 %v543_v23  ;;  %v283_v23 = vld [vmem:[#allocation5 + $0x30] sm:$0xff]  ;;  %v261_v27 = vld [vmem:[#allocation2 + $0x8] sm:$0xff] }
  0x8c   :  { %v548_v31 = vpop.permute.xlu1 %547  ;;  %v538_v43 = vpop.permute.xlu0 %537 }
  0x8d   :  { %v550_v35 = vunpack.i.h.bf16 %v548_v31  ;;  %v549_v36 = vunpack.i.l.bf16 %v548_v31  ;;  %v540_v51 = vunpack.i.h.bf16 %v538_v43  ;;  %v539_v52 = vunpack.i.l.bf16 %v538_v43  ;;  %v282_v43 = vld [vmem:[#allocation5 + $0x28] sm:$0xff] }
  0x91   :  { %v105_v21 = vpop.f32.mrf.mxu0 }
  0x92   :  { %v777_v24 = vadd.f32 %v571_v22, %v105_v21 }
  0x94   :  { %v111_v26 = vpack.c.bf16 %v777_v24, %v777_v24 }
  0x96   :  { %v123_v32 = vunpack.c.l.b16 %v111_v26 }
  0x99   :  { %v107_v25 = vpop.f32.mrf.mxu0 }
  0x9a   :  { %v108_v28 = vadd.f32 %v571_v22, %v107_v25  ;;  %v284_v22 = vld [vmem:[#allocation5 + $0x38] sm:$0xff] }
  0x9b   :  { %299 = vmatpush.msra.mxu2 %v284_v22 }
  0x9c   :  { %v110_v29 = vpack.c.bf16 %v108_v28, %v777_v24  ;;  %v112_v30 = vpack.c.bf16 %v108_v28, %v108_v28 }
  0x9d   :  { %300 = vmatpush.msra.mxu2 %v283_v23 }
  0x9e   :  { %v124_v33 = vunpack.c.l.b16 %v112_v30 }
  0x9f   :  { %301 = vmatpush.msra.mxu2 %v282_v43 }
  0xa0   :  { %v125_v34 = vpack.c.b16 %v124_v33, %v123_v32 }
  0xa2   :  { %v782_v41 = vunpack.c.l.bf16 %v125_v34  ;;  %v784_v42 = vunpack.c.h.bf16 %v125_v34 }
  0xa4   :  { %v169_v44 = vmul.f32 %v549_v36, %v782_v41  ;;  %v170_v45 = vmul.f32 %v550_v35, %v784_v42  ;;  %v175_v46 = vmul.f32 %v534_v38, %v782_v41  ;;  %v176_v47 = vmul.f32 %v535_v37, %v784_v42 }
  0xa5   :  { %v171_v48 = vmul.f32 %v544_v40, %v782_v41  ;;  %v172_v49 = vmul.f32 %v545_v39, %v784_v42  ;;  %v173_v55 = vmul.f32 %v539_v52, %v782_v41  ;;  %v174_v56 = vmul.f32 %v540_v51, %v784_v42 }
  0xa6   :  { %v177_v50 = vpack.c.bf16 %v170_v45, %v169_v44  ;;  %v180_v53 = vpack.c.bf16 %v176_v47, %v175_v46  ;;  %v281_v44 = vld [vmem:[#allocation5 + $0x20] sm:$0xff]  ;;  %v280_v45 = vld [vmem:[#allocation5 + $0x18] sm:$0xff]  ;;  %v279_v46 = vld [vmem:[#allocation5 + $0x10] sm:$0xff] }
  0xa7   :  { %v178_v54 = vpack.c.bf16 %v172_v49, %v171_v48  ;;  %v179_v57 = vpack.c.bf16 %v174_v56, %v173_v55  ;;  %302 = vmatpush.msra.mxu2 %v281_v44  ;;  %v278_v47 = vld [vmem:[#allocation5 + $0x8] sm:$0xff]  ;;  %v277_v48 = vld [vmem:[#allocation5] sm:$0xff] }
  0xa8   :  { %221 = vrot.lane.b32.xlu1 %v177_v50, %s672_s2  ;;  %227 = vrot.lane.b32.xlu2 %v180_v53, %s672_s2 }
  0xa9   :  { %223 = vrot.lane.b32.xlu0 %v178_v54, %s672_s2  ;;  %303 = vmatpush.msra.mxu2 %v280_v45 }
  0xab   :  { %304 = vmatpush.msra.mxu2 %v279_v46 }
  0xad   :  { %305 = vmatpush.msra.mxu2 %v278_v47 }
  0xaf   :  { %306 = vmatpush.msra.mxu2 %v277_v48  ;;  %v573_v48 = vld [vmem:[%s855_s5] ss:$0 sm:$0xff]  ;;  %s675_s5 = smov [#allocation7]  }
  0xb0   :  { %552 = vrot.lane.b32.xlu1 %v531_v11, %s673_s19  ;;  %225 = vrot.lane.b32.xlu2 %v179_v57, %s672_s2  ;;  %s461_s28 = sshll.u32 %s675_s5, 4  ;;  %s462_s28 = int_to_ptr.vmem [resolvable:$true] %s461_s28 }
  0xb8   :  { %557 = vrot.lane.b32.xlu1 %v536_v19, %s673_s19 }
  0xc0   :  { %562 = vrot.lane.b32.xlu1 %v541_v14, %s673_s19 }
  0xc8   :  { %567 = vrot.lane.b32.xlu1 %v546_v20, %s673_s19  ;;  %v260_v20 = vld [vmem:[#allocation2] sm:$0xff] }
 0x102   :  { %v228_v58 = vpop.permute.xlu2 %227 }
 0x103   :  { %v242_v59 = vsel %vm92_vm0, %v228_v58, 0  ;;  %v502_v58 = vld [vmem:[%s853_s3 + $0x8] sm:$0xff] }
 0x104   :  { %248 = vmatpush.bf16.xpose.msra.mxu1 %v242_v59  ;;  %382 = vmatpush.bf16.msrb.mxu0 %v502_v58 }
 0x10a   :  { %v226_v60 = vpop.permute.xlu2 %225 }
 0x10b   :  { %v239_v61 = vsel %vm92_vm0, %v226_v60, 0 }
 0x10c   :  { %249 = vmatpush.bf16.xpose.msra.mxu1 %v239_v61 }
 0x11a   :  { %v222_v62 = vpop.permute.xlu1 %221 }
 0x11b   :  { %v224_v63 = vpop.permute.xlu0 %223  ;;  %v233_v6 = vsel %vm92_vm0, %v222_v62, 0 }
 0x11c   :  { %v236_v0 = vsel %vm92_vm0, %v224_v63, 0 }
 0x11d   :  { %250 = vmatpush.bf16.xpose.msra.mxu1 %v236_v0 }
 0x122   :  { %v553_v1 = vpop.permute.xlu1 %552 }
 0x123   :  { %v555_v2 = vunpack.i.h.bf16 %v553_v1  ;;  %v554_v3 = vunpack.i.l.bf16 %v553_v1 }
 0x125   :  { %v212_v7 = vmul.f32 %v555_v2, %v784_v42  ;;  %v211_v8 = vmul.f32 %v554_v3, %v782_v41  ;;  %251 = vmatpush.bf16.xpose.msra.mxu1 %v233_v6  ;;  %v501_v2 = vld [vmem:[%s853_s3] sm:$0xff] }
 0x126   :  { %383 = vmatpush.bf16.msrb.mxu0 %v501_v2 }
 0x127   :  { %v216_v9 = vpack.c.bf16 %v212_v7, %v211_v8  ;;  %v572_v8 = vld [vmem:[%s854_s4] ss:$0 sm:$0xff] }
 0x129   :  { %329 = vrot.lane.b32.xlu1 %v216_v9, %s673_s19 }
 0x12a   :  { %v558_v10 = vpop.permute.xlu1 %557 }
 0x12b   :  { %v560_v31 = vunpack.i.h.bf16 %v558_v10  ;;  %v559_v32 = vunpack.i.l.bf16 %v558_v10 }
 0x12c   :  { %486 = vmatmul.msk.bf16.vlgmr.msra.gmra.mxu1 %vm92_vm0, %v110_v29 }
 0x12d   :  { %v210_v33 = vmul.f32 %v560_v31, %v784_v42  ;;  %v209_v34 = vmul.f32 %v559_v32, %v782_v41 }
 0x12f   :  { %v215_v39 = vpack.c.bf16 %v210_v33, %v209_v34 }
 0x132   :  { %v563_v11 = vpop.permute.xlu1 %562 }
 0x133   :  { %v565_v12 = vunpack.i.h.bf16 %v563_v11  ;;  %v564_v13 = vunpack.i.l.bf16 %v563_v11 }
 0x135   :  { %v208_v14 = vmul.f32 %v565_v12, %v784_v42  ;;  %v207_v15 = vmul.f32 %v564_v13, %v782_v41 }
 0x137   :  { %v214_v16 = vpack.c.bf16 %v208_v14, %v207_v15 }
 0x139   :  { %325 = vrot.lane.b32.xlu1 %v214_v16, %s673_s19 }
 0x13a   :  { %v568_v17 = vpop.permute.xlu1 %567 }
 0x13b   :  { %v570_v35 = vunpack.i.h.bf16 %v568_v17  ;;  %v569_v36 = vunpack.i.l.bf16 %v568_v17  ;;  %v674_v17 = vmov 32.0  }
 0x13d   :  { %v206_v37 = vmul.f32 %v570_v35, %v784_v42  ;;  %v205_v38 = vmul.f32 %v569_v36, %v782_v41 }
 0x13f   :  { %v213_v40 = vpack.c.bf16 %v206_v37, %v205_v38 }
 0x19b   :  { %v330_v18 = vpop.permute.xlu1 %329 }
 0x19c   :  { %342 = vmatpush.bf16.msra.mxu3 %v330_v18 }
 0x1a9   :  { %v253_v19 = vpop.f32.mrf.mxu1 }
 0x1aa   :  { %v258_v21 = vmul.f32 0.35355338, %v253_v19 }
 0x1ab   :  { %v326_v55 = vpop.permute.xlu1 %325 }
 0x1ac   :  { %v262_v24 = vadd.f32 %v260_v20, %v258_v21 }
 0x1ae   :  { %v265_v25 = vsel %vm264_vm1, %v262_v24, -inf }
 0x1af   :  { %266 = vmax.xlane.f32.xlu2 %v265_v25 }
 0x1b1   :  { %v255_v26 = vpop.f32.mrf.mxu1 }
 0x1b2   :  { %v259_v28 = vmul.f32 0.35355338, %v255_v26 }
 0x1b4   :  { %v263_v29 = vadd.f32 %v261_v27, %v259_v28 }
 0x1b6   :  { %v268_v30 = vsel %vm264_vm1, %v263_v29, -inf }
 0x1b7   :  { %269 = vmax.xlane.f32.xlu0 %v268_v30 }
 0x1c7   :  { %327 = vrot.lane.b32.xlu2 %v215_v39, %s673_s19 }
 0x1cb   :  { %323 = vrot.lane.b32.xlu0 %v213_v40, %s673_s19 }
 0x222   :  { %v267_v42 = vpop.xlane.xlu2 %266 }
 0x223   :  { %v271_v41 = vsub.f32 %v262_v24, %v267_v42 }
 0x225   :  { %v273_v49 = vmul.f32 1.442695, %v271_v41 }
 0x227   :  { %575 = vpow2.f32 %v273_v49 }
 0x22a   :  { %v328_v50 = vpop.permute.xlu2 %327  ;;  %v270_v51 = vpop.xlane.xlu0 %269 }
 0x22b   :  { %v272_v52 = vsub.f32 %v263_v29, %v270_v51  ;;  %343 = vmatpush.bf16.msra.mxu3 %v328_v50  ;;  %v574_v50 = vld [vmem:[%s856_s6] ss:$0 sm:$0xff] }
 0x22d   :  { %v576_v53 = vpop.eup %575  ;;  %v275_v54 = vmul.f32 1.442695, %v272_v52 }
 0x22e   :  { %487 = vmatmul.msk.f32.vlgmr.msra.gmra.mxu2 %vm264_vm1, %v576_v53 }
 0x22f   :  { %577 = vpow2.f32 %v275_v54  ;;  %344 = vmatpush.bf16.msra.mxu3 %v326_v55 }
 0x235   :  { %v578_v56 = vpop.eup %577 }
 0x236   :  { %488 = vmatmul.msk.f32.gmra.mxu2 %vm264_vm1, %v578_v56 }
 0x23d   :  { %v324_v57 = vpop.permute.xlu0 %323 }
 0x23e   :  { %345 = vmatpush.bf16.msra.mxu3 %v324_v57 }
 0x2b1   :  { %v308_v59 = vpop.f32.mrf.mxu2 }
 0x2b2   :  { %579 = vrcp.f32 %v308_v59 }
 0x2b8   :  { %v580_v61 = vpop.eup %579 }
 0x2b9   :  { %v311_v60 = vpop.f32.mrf.mxu2  ;;  %v316_v63 = vmul.f32 %v580_v61, %v576_v53 }
 0x2ba   :  { %581 = vrcp.f32 %v311_v60 }
 0x2bb   :  { %583 = vrcp.f32 %v674_v17 }
 0x2c0   :  { %v582_v62 = vpop.eup %581 }
 0x2c1   :  { %v317_v0 = vmul.f32 %v582_v62, %v578_v56  ;;  %v584_v18 = vpop.eup %583 }
 0x2c2   :  { %v399_v19 = vmul.f32 32.0, %v584_v18  ;;  %vm403_vm2 = vweird.f32 %v584_v18 }
 0x2c3   :  { %v318_v1 = vpack.c.bf16 %v317_v0, %v316_v63 }
 0x2c4   :  { %v400_v20 = vsub.f32 1.0, %v399_v19 }
 0x2c5   :  { %489 = vmatmul.msk.bf16.vlgmr.msra.gmra.mxu3 %vm264_vm1, %v318_v1 }
 0x2c6   :  { %v401_v21 = vmul.f32 %v584_v18, %v400_v20 }
 0x2c8   :  { %v402_v22 = vadd.f32 %v584_v18, %v401_v21 }
 0x2ca   :  { %v404_v23 = vsel %vm403_vm2, %v584_v18, %v402_v22 }
 0x348   :  { %v347_v3 = vpop.f32.mrf.mxu3 }
 0x350   :  { %v349_v6 = vpop.f32.mrf.mxu3 }
 0x351   :  { %v352_v7 = vpack.c.bf16 %v349_v6, %v347_v3 }
 0x353   :  { %498 = vmatmul.msk.bf16.vlgmr.msrb.gmra.mxu0 %vm92_vm0, %v352_v7 }
 0x3d0   :  { %v385_v9 = vpop.f32.mrf.mxu0 }
 0x3d1   :  { %v386_v10 = vadd.f32 %v572_v8, %v385_v9 }
 0x3d3   :  { %v390_v11 = vadd.f32 %v386_v10, %v758_v4 }
 0x3d5   :  { %v392_v12 = vsel %vm92_vm0, %v390_v11, 0.0 }
 0x3d6   :  { %393 = vadd.xlane.f32.xlu1 %v392_v12 }
 0x3d8   :  { %v387_v13 = vpop.f32.mrf.mxu0 }
 0x3d9   :  { %v388_v14 = vadd.f32 %v572_v8, %v387_v13 }
 0x3db   :  { %v391_v15 = vadd.f32 %v388_v14, %v763_v5 }
 0x3dd   :  { %v395_v16 = vsel %vm92_vm0, %v391_v15, 0.0 }
 0x3de   :  { %396 = vadd.xlane.f32.xlu2 %v395_v16 }
 0x449   :  { %v394_v4 = vpop.xlane.xlu1 %393 }
 0x44a   :  { %v405_v24 = vmul.f32 %v404_v23, %v394_v4 }
 0x44c   :  { %v407_v25 = vsub.f32 %v390_v11, %v405_v24 }
 0x44e   :  { %v409_v26 = vmul.f32 %v407_v25, %v407_v25 }
 0x450   :  { %v411_v27 = vsel %vm92_vm0, %v409_v26, 0.0 }
 0x451   :  { %v397_v28 = vpop.xlane.xlu2 %396  ;;  %412 = vadd.xlane.f32.xlu0 %v411_v27 }
 0x452   :  { %v406_v5 = vmul.f32 %v404_v23, %v397_v28 }
 0x454   :  { %v408_v29 = vsub.f32 %v391_v15, %v406_v5 }
 0x456   :  { %v410_v30 = vmul.f32 %v408_v29, %v408_v29 }
 0x458   :  { %v414_v31 = vsel %vm92_vm0, %v410_v30, 0.0 }
 0x459   :  { %415 = vadd.xlane.f32.xlu1 %v414_v31 }
 0x4c4   :  { %v413_v32 = vpop.xlane.xlu0 %412 }
 0x4c5   :  { %v417_v33 = vmul.f32 %v413_v32, %v404_v23 }
 0x4c7   :  { %v419_v34 = vadd.f32 1e-12, %v417_v33 }
 0x4c9   :  { %585 = vrsqrt.f32 %v419_v34  ;;  %vm427_vm4 = vweird.f32 %v419_v34 }
 0x4cc   :  { %v416_v35 = vpop.xlane.xlu1 %415 }
 0x4cd   :  { %v418_v36 = vmul.f32 %v416_v35, %v404_v23 }
 0x4cf   :  { %v586_v37 = vpop.eup %585  ;;  %v420_v38 = vadd.f32 1e-12, %v418_v36 }
 0x4d0   :  { %v422_v39 = vmul.f32 %v586_v37, %v419_v34  ;;  %vm428_vm3 = vweird.f32 %v586_v37 }
 0x4d1   :  { %587 = vrsqrt.f32 %v420_v38  ;;  %vm429_vm5 = vmor %vm427_vm4, %vm428_vm3  ;;  %vm437_vm7 = vweird.f32 %v420_v38 }
 0x4d2   :  { %v423_v40 = vmul.f32 %v586_v37, %v422_v39 }
 0x4d4   :  { %v424_v43 = vmul.f32 0.5, %v423_v40 }
 0x4d6   :  { %v425_v44 = vsub.f32 1.5, %v424_v43 }
 0x4d7   :  { %v588_v45 = vpop.eup %587 }
 0x4d8   :  { %v426_v46 = vmul.f32 %v586_v37, %v425_v44  ;;  %v432_v47 = vmul.f32 %v588_v45, %v420_v38  ;;  %vm438_vm6 = vweird.f32 %v588_v45 }
 0x4d9   :  { %vm439_vm8 = vmor %vm437_vm7, %vm438_vm6 }
 0x4da   :  { %v430_v42 = vsel %vm429_vm5, %v586_v37, %v426_v46  ;;  %v433_v41 = vmul.f32 %v588_v45, %v432_v47 }
 0x4db   :  { %v441_v49 = vmul.f32 %v430_v42, %v407_v25 }
 0x4dc   :  { %v434_v51 = vmul.f32 0.5, %v433_v41 }
 0x4dd   :  { %v447_v52 = vmul.f32 %v573_v48, %v441_v49 }
 0x4de   :  { %v435_v53 = vsub.f32 1.5, %v434_v51 }
 0x4df   :  { %v453_v54 = vadd.f32 %v574_v50, %v447_v52 }
 0x4e0   :  { %v436_v55 = vmul.f32 %v588_v45, %v435_v53 }
 0x4e1   :  { %455 = vst.msk [vmem:[#allocation7] sm:$0xff] %vm92_vm0, %v453_v54 }
 0x4e2   :  { %v440_v56 = vsel %vm439_vm8, %v588_v45, %v436_v55 }
 0x4e3   :  { %v442_v57 = vmul.f32 %v440_v56, %v408_v29 }
 0x4e5   :  { %v448_v58 = vmul.f32 %v573_v48, %v442_v57 }
 0x4e7   :  { %v454_v59 = vadd.f32 %v574_v50, %v448_v58 }
 0x4e9   :  { %456 = vst.msk [vmem:[#allocation7 + $0x8] sm:$0xff] %vm92_vm0, %v454_v59 }
 0x4ea   :  { %469 = dma.vmem_to_hbm [thread:$0]  %s462_s28, 256, %s464_s11, [#allocation4], %s668_s21, %s668_s21, %s669_s22  }
 0x4eb   :  { %665 = dma.done.wait [#allocation4], 256  }
 0x4ec   :  { %666 = vsyncadd [#allocation4], 4294967040 }
 0x4ed   :  { %474 = vsyncpa [#allocation3], 1 }
 0x4ee   :  { %475 = vsyncpa [#allocation6], 1 }
 0x4ef   :  { %476 = vsyncpa [#allocation4], 1 }

</bundles_post_ra>
